<compile_context>
chip_gen: v7x
topology: tpu7x:2x2x1
jax: 0.10.0
libtpu: 0.0.40
codegen_flags: <defaults>
</compile_context>

<pallas_src>
import functools

import jax
import jax.numpy as jnp
from jax.experimental import pallas as pl
from jax.experimental.pallas import tpu as pltpu


def _round_up(x: int, m: int) -> int:
    return ((x + m - 1) // m) * m


def _cdiv(a: int, b: int) -> int:
    return (a + b - 1) // b


def _mean_std_kernel(x_ref, mean_ref, std_ref, o_ref, *, mode_reverse: bool):
    x = x_ref[...]                      # (tile_b, tile_d)
    m = mean_ref[...]                   # (1, tile_d) -> broadcasts over batch rows
    s = std_ref[...]                    # (1, tile_d)
    if mode_reverse:
        o_ref[...] = x * s + m
    else:
        # One reciprocal on the (1, tile_d) stats row + broadcast multiply:
        # sub + mul per element.  Cheap (hidden under HBM stalls) and avoids a
        # full-tile divide through the single EUP slot.
        inv_s = 1.0 / s
        o_ref[...] = (x - m) * inv_s


def mean_std_layer(x, mean, std, *, mode_reverse: bool = False,
                   tile_b: int | None = None, tile_d: int | None = None):
    """Apply Mean_std_layer forward pass with a Pallas TPU kernel.

    x:    (B, size_in)
    mean: (1, size_in)
    std:  (1, size_in)
    """
    B, D = x.shape
    assert mean.shape == (1, D) and std.shape == (1, D)
    dtype = x.dtype
    itemsize = jnp.dtype(dtype).itemsize
    # Sublane packing for the second-to-last block dim: 8 f32, 16 bf16, 32 int8/fp8.
    sub = max(8, 32 // itemsize)

    # ---- generation-aware VMEM streaming budget ------------------------------
    # 4 live (tile_b, tile_d) tiles: double-buffered x + double-buffered out.
    try:
        vmem_cap = int(pltpu.get_tpu_info().vmem_capacity_bytes)
    except Exception:
        vmem_cap = 64 << 20                       # conservative (v7x per-TC VMEM)
    budget = min(32 << 20, (vmem_cap * 3) // 8)   # 32 MiB on v5e/v6e, 24 MiB on v7x

    # ---- feature-dim tiling: prefer full rows (one contiguous DMA per block) --
    if tile_d is None:
        if 4 * sub * D * itemsize <= budget:
            tile_d = D                            # full feature row, no D split
        else:
            # TODO(synk): only reached for extremely wide features; lane-dense
            # 128-multiples with a masked ragged last D block.
            tile_d = min(D, max(512, ((budget // (4 * sub * itemsize)) // 128) * 128))
    num_d = _cdiv(D, tile_d)

    # ---- batch-dim tiling ------------------------------------------------------
    if tile_b is None:
        max_rows = budget // (4 * tile_d * itemsize)
        max_rows = max(sub, (max_rows // sub) * sub)
        # Keep >= ~4 blocks along the parallel batch axis when B permits so the
        # grid can shard across v7x's two TensorCores; cap block rows at 2048.
        par_cap = max(sub, _round_up(_cdiv(B, 4), sub))
        tile_b = int(min(max_rows, 2048, par_cap, _round_up(B, sub)))
    num_b = _cdiv(B, tile_b)

    # ---- explicit VMEM limit with headroom (<= half of physical VMEM) ---------
    vmem_needed = (4 * tile_b * tile_d + 4 * tile_d) * itemsize
    vmem_limit = int(max(16 << 20, min(vmem_needed + (4 << 20), vmem_cap // 2)))

    kernel = functools.partial(_mean_std_kernel, mode_reverse=mode_reverse)

    # No padding of x and no output slice: ragged boundary blocks are handled by
    # Pallas (padded reads are elementwise-safe; out-of-bounds writes are masked).
    return pl.pallas_call(
        kernel,
        out_shape=jax.ShapeDtypeStruct((B, D), dtype),
        grid_spec=pltpu.PrefetchScalarGridSpec(
            num_scalar_prefetch=0,
            # D tiles outer, B tiles inner: the (1, tile_d) mean/std block index
            # is constant over the whole inner batch loop, so the stats stay
            # resident in VMEM instead of being re-DMA'd every grid step.
            grid=(num_d, num_b),
            in_specs=[
                pl.BlockSpec((tile_b, tile_d), lambda dj, bi: (bi, dj)),  # x tile
                pl.BlockSpec((1, tile_d), lambda dj, bi: (0, dj)),        # mean row
                pl.BlockSpec((1, tile_d), lambda dj, bi: (0, dj)),        # std row
            ],
            out_specs=pl.BlockSpec((tile_b, tile_d), lambda dj, bi: (bi, dj)),
        ),
        compiler_params=pltpu.CompilerParams(
            dimension_semantics=("parallel", "parallel"),
            vmem_limit_bytes=vmem_limit,
        ),
    )(x, mean, std)


if __name__ == "__main__":
    key = jax.random.PRNGKey(0)
    kx, km, ks, kx2, km2, ks2, kx3 = jax.random.split(key, 7)

    # ---- test 1: small shapes, forward + reverse round-trip ------------------
    B, SIZE_IN = 8, 32
    x = jax.random.normal(kx, (B, SIZE_IN), dtype=jnp.float32)
    mean = jax.random.normal(km, (1, SIZE_IN), dtype=jnp.float32)
    std = jax.random.uniform(ks, (1, SIZE_IN), dtype=jnp.float32,
                             minval=0.5, maxval=2.0)

    y = mean_std_layer(x, mean, std, mode_reverse=False)
    jax.block_until_ready(y)
    y_ref = (x - mean) / std
    assert jnp.allclose(y, y_ref, atol=1e-6, rtol=1e-6)

    z = mean_std_layer(y, mean, std, mode_reverse=True)
    jax.block_until_ready(z)
    z_ref = y_ref * std + mean
    assert jnp.allclose(z, z_ref, atol=1e-6, rtol=1e-6)
    assert jnp.allclose(z, x, atol=1e-5, rtol=1e-5)

    # ---- test 2: ragged shapes (masked last batch block, no wrapper padding) --
    B2, SIZE_IN2 = 10, 70
    x2 = jax.random.normal(kx2, (B2, SIZE_IN2), dtype=jnp.float32)
    mean2 = jax.random.normal(km2, (1, SIZE_IN2), dtype=jnp.float32)
    std2 = jax.random.uniform(ks2, (1, SIZE_IN2), dtype=jnp.float32,
                              minval=0.5, maxval=2.0)
    y2 = mean_std_layer(x2, mean2, std2, mode_reverse=False)
    jax.block_until_ready(y2)
    assert jnp.allclose(y2, (x2 - mean2) / std2, atol=1e-6, rtol=1e-6)

    # ---- test 3: multi-block batch grid ---------------------------------------
    B3, SIZE_IN3 = 300, 256
    x3 = jax.random.normal(kx3, (B3, SIZE_IN3), dtype=jnp.float32)
    mean3 = jnp.full((1, SIZE_IN3), 0.25, dtype=jnp.float32)
    std3 = jnp.full((1, SIZE_IN3), 2.0, dtype=jnp.float32)
    y3 = mean_std_layer(x3, mean3, std3, mode_reverse=False)
    jax.block_until_ready(y3)
    assert jnp.allclose(y3, (x3 - mean3) / std3, atol=1e-6, rtol=1e-6)
    z3 = mean_std_layer(y3, mean3, std3, mode_reverse=True)
    jax.block_until_ready(z3)
    assert jnp.allclose(z3, x3, atol=1e-5, rtol=1e-5)

    print("KERNEL_OK")
</pallas_src>

<mosaic_0001>
module attributes {stable_mosaic.version = 11 : i64} {
  func.func @_mean_std_kernel(%arg0: i32, %arg1: i32, %arg2: memref<8x32xf32, #tpu.memory_space<vmem>>, %arg3: memref<1x32xf32, #tpu.memory_space<vmem>>, %arg4: memref<1x32xf32, #tpu.memory_space<vmem>>, %arg5: memref<8x32xf32, #tpu.memory_space<vmem>>) attributes {dimension_semantics = [#tpu.dimension_semantics<parallel>, #tpu.dimension_semantics<parallel>], iteration_bounds = array<i64: 1, 1>, scalar_prefetch = 0 : i64, scratch_operands = 0 : i64, tpu.core_type = #tpu.core_type<tc>, window_params = [{transform_indices = @transform_0, window_bounds = array<i64: 8, 32>}, {transform_indices = @transform_1, window_bounds = array<i64: 1, 32>}, {transform_indices = @transform_2, window_bounds = array<i64: 1, 32>}, {transform_indices = @transform_3, window_bounds = array<i64: 8, 32>}]} {
    %c0 = arith.constant 0 : index
    %c0_0 = arith.constant 0 : index
    %0 = vector.load %arg2[%c0, %c0_0] : memref<8x32xf32, #tpu.memory_space<vmem>>, vector<8x32xf32>
    %c0_1 = arith.constant 0 : index
    %c0_2 = arith.constant 0 : index
    %1 = vector.load %arg3[%c0_1, %c0_2] : memref<1x32xf32, #tpu.memory_space<vmem>>, vector<1x32xf32>
    %c0_3 = arith.constant 0 : index
    %c0_4 = arith.constant 0 : index
    %2 = vector.load %arg4[%c0_3, %c0_4] : memref<1x32xf32, #tpu.memory_space<vmem>>, vector<1x32xf32>
    %cst = arith.constant 1.000000e+00 : f32
    %3 = vector.broadcast %cst : f32 to vector<1x32xf32>
    %4 = arith.divf %3, %2 : vector<1x32xf32>
    %5 = vector.broadcast %1 : vector<1x32xf32> to vector<8x32xf32>
    %6 = arith.subf %0, %5 : vector<8x32xf32>
    %7 = vector.broadcast %4 : vector<1x32xf32> to vector<8x32xf32>
    %8 = arith.mulf %6, %7 : vector<8x32xf32>
    %c0_5 = arith.constant 0 : index
    %c0_6 = arith.constant 0 : index
    %9 = vector.load %arg5[%c0_5, %c0_6] : memref<8x32xf32, #tpu.memory_space<vmem>>, vector<8x32xf32>
    tpu.vector_store %arg5[%c0_5, %c0_6], %8 {strides = array<i32>} : memref<8x32xf32, #tpu.memory_space<vmem>>, vector<8x32xf32>,
    return
  }
  func.func @transform_0(%arg0: i32, %arg1: i32) -> (i32, i32) {
    %c0_i32 = arith.constant 0 : i32
    return %arg1, %arg0 : i32, i32
  }
  func.func @transform_1(%arg0: i32, %arg1: i32) -> (i32, i32) {
    %c0_i32 = arith.constant 0 : i32
    %c0_i32_0 = arith.constant 0 : i32
    return %c0_i32, %arg0 : i32, i32
  }
  func.func @transform_2(%arg0: i32, %arg1: i32) -> (i32, i32) {
    %c0_i32 = arith.constant 0 : i32
    %c0_i32_0 = arith.constant 0 : i32
    return %c0_i32, %arg0 : i32, i32
  }
  func.func @transform_3(%arg0: i32, %arg1: i32) -> (i32, i32) {
    %c0_i32 = arith.constant 0 : i32
    return %arg1, %arg0 : i32, i32
  }
}

</mosaic_0001>

<bundles_post_ra>
// kernel: tpu_custom_call.1
= control target key start
LH: loop header
LB: loop body
LE: loop exit
PB: predicated region body
PF: predicated region fallthrough
CT: control target
= control target key end

     0   :  { %8 = vsyncpa [#allocation3], 0  ;;  %s168_s0 = inlined_call_operand.hbm [shape: f32[8,32], index: 0, kind: input, shape index: {}]   ;;  %s169_s1 = inlined_call_operand.vmem [shape: f32[1,32], index: 1, kind: input, shape index: {}]   ;;  %s170_s2 = inlined_call_operand.vmem [shape: f32[1,32], index: 2, kind: input, shape index: {}]   ;;  %s171_s3 = inlined_call_operand.hbm [shape: f32[8,32], index: 3, kind: output, shape index: {}]  }
   0x1   :  { %9 = vsyncpa [#allocation4], 0  ;;  %s116_s12 = smov [#allocation2]   ;;  %s68_s16 = scalar_lea.hbm %s168_s0, 128 }
   0x2   :  { %s16_s13 = sshll.u32 %s116_s12, 4  ;;  %p69_p0 = scmp.ne.s32.totalorder %s168_s0, %s68_s16  ;;  %s17_s13 = int_to_ptr.vmem [resolvable:$true] %s16_s13 }
   0x3   :  { %p72_p1 = scmp.lt.u32.totalorder %s68_s16, %s168_s0 }
   0x5   :  { %p74_p2 = pnand %p72_p1, %p69_p0 }
   0x7   :  { %77 = shalt.err (!%p74_p2)
}
   0x8   :  { %s78_s21 = scalar_lea.vmem %s17_s13, 128  ;;  %p83_p4 = scmp.lt.s32.totalorder %s17_s13, %s17_s13 }
   0x9   :  { %p79_p3 = scmp.ne.s32.totalorder %s17_s13, %s78_s21  ;;  %p84_p5 = scmp.lt.s32.totalorder %s78_s21, %s78_s21 }
   0xb   :  { %p85_p6 = por %p84_p5, %p83_p4 }
   0xd   :  { %p86_p7 = pnand %p85_p6, %p79_p3 }
   0xf   :  { %89 = shalt.err (!%p86_p7)
}
  0x10   :  { %19 = dma.hbm_to_vmem [thread:$0]  %s168_s0, 128, %s17_s13, [#allocation3]  }
  0x11   :  { %112 = dma.done.wait [#allocation3], 128  }
  0x12   :  { %113 = vsyncadd [#allocation3], 4294967168  ;;  %v29_v0 = vld [vmem:[%s170_s2] sm:$0x1]  ;;  %v40_v1 = vlaneseq  ;;  %s117_s28 = smov [#allocation5]   ;;  %vm46_vm0 = vcmask 261120  }
  0x13   :  { %66 = vrcp.f32 %v29_v0  ;;  %v27_v3 = vld [vmem:[#allocation2] sm:$0xff]  ;;  %s54_s29 = sshll.u32 %s117_s28, 4  ;;  %s55_s29 = int_to_ptr.vmem [resolvable:$true] %s54_s29 }
  0x14   :  { %v41_v2 = vshrl.u32 %v40_v1, 7  ;;  %v63_v4 = vld [vmem:[%s169_s1] ss:$0 sm:$0xff]  ;;  %s90_s0 = scalar_lea.vmem %s55_s29, 128  ;;  %p95_p9 = scmp.lt.s32.totalorder %s55_s29, %s55_s29 }
  0x15   :  { %v38_v6 = vsub.f32 %v27_v3, %v63_v4  ;;  %p91_p8 = scmp.ne.s32.totalorder %s55_s29, %s90_s0  ;;  %p96_p10 = scmp.lt.s32.totalorder %s90_s0, %s90_s0 }
  0x16   :  { %v42_v5 = vsub.s32 0, %v41_v2 }
  0x17   :  { %p97_p11 = por %p96_p10, %p95_p9 }
  0x19   :  { %p98_p12 = pnand %p97_p11, %p91_p8 }
  0x1d   :  { %v67_v7 = vpop.eup %66 }
  0x1e   :  { %v43_v8 = vrot.slane %v67_v7, %v42_v5 }
  0x20   :  { %v45_v9 = vmul.f32 %v43_v8, %v38_v6 }
  0x22   :  { %47 = vst.msk [vmem:[#allocation5] sm:$0xff] %vm46_vm0, %v45_v9 }
  0x23   :  { %101 = shalt.err (!%p98_p12)
}
  0x24   :  { %s102_s1 = scalar_lea.hbm %s171_s3, 128 }
  0x25   :  { %p103_p13 = scmp.ne.s32.totalorder %s171_s3, %s102_s1  ;;  %p106_p0 = scmp.lt.u32.totalorder %s102_s1, %s171_s3 }
  0x27   :  { %p108_p1 = pnand %p106_p0, %p103_p13 }
  0x29   :  { %111 = shalt.err (!%p108_p1)
}
  0x2a   :  { %57 = dma.vmem_to_hbm [thread:$0]  %s55_s29, 128, %s171_s3, [#allocation4]  }
  0x2b   :  { %114 = dma.done.wait [#allocation4], 128  }
  0x2c   :  { %115 = vsyncadd [#allocation4], 4294967168 }
  0x2d   :  { %61 = vsyncpa [#allocation3], 1 }
  0x2e   :  { %62 = vsyncpa [#allocation4], 1 }

</bundles_post_ra>
